<compile_context>
chip_gen: v7x
topology: tpu7x:2x2x1
jax: 0.10.0
libtpu: 0.0.40
codegen_flags: <defaults>
</compile_context>

<pallas_src>
import functools
import math

import jax
import jax.numpy as jnp
from jax import lax
from jax.experimental import pallas as pl
from jax.experimental.pallas import tpu as pltpu

GN_GROUPS = 32
GN_EPS = 1e-5


def _vmem_capacity():
    try:
        return int(pltpu.get_tpu_info().vmem_capacity_bytes)
    except Exception:
        return 64 * 1024 * 1024


_VMEM_CAP = _vmem_capacity()
_VMEM_LIMIT = int(min((_VMEM_CAP * 3) // 4, 100 * 1024 * 1024))
_HW_TILE_TARGET = 2048 if _VMEM_CAP >= 96 * 1024 * 1024 else 1024


def _cparams(sem):
    return pltpu.CompilerParams(dimension_semantics=sem,
                                vmem_limit_bytes=_VMEM_LIMIT)


def _round_up(v, m):
    return ((v + m - 1) // m) * m


def _pad_axis(x, axis, new_size):
    pad = new_size - x.shape[axis]
    if pad <= 0:
        return x
    widths = [(0, 0)] * x.ndim
    widths[axis] = (0, pad)
    return jnp.pad(x, widths)


def _hw_tiling(hw, target=None):
    """Return (tile, padded_hw).  tile is a multiple of 128 when tiling is
    needed; otherwise the whole (small) pixel axis is one block."""
    if target is None:
        target = _HW_TILE_TARGET
    if hw <= target:
        return hw, hw
    best = 0
    t = 128
    while t <= target:
        if hw % t == 0:
            best = t
        t += 128
    if best >= 512:                      # big enough divisor -> no padding
        return best, hw
    return target, _round_up(hw, target)  # pad HW; padded rows masked/ignored


# ---------------------------------------------------------------------------
# Adaptive-average-pool / bilinear-upsample matrices (exact torch semantics).
# ---------------------------------------------------------------------------
def _adaptive_pool_matrix_1d(size, out):
    idx = jnp.arange(size)[:, None]
    o = jnp.arange(out, dtype=jnp.float32)
    starts = jnp.floor(o * size / out).astype(jnp.int32)[None, :]
    ends = jnp.ceil((o + 1.0) * size / out).astype(jnp.int32)[None, :]
    m = ((idx >= starts) & (idx < ends)).astype(jnp.float32)
    return m / (ends - starts).astype(jnp.float32)          # (size, out)


def _pool_matrix_2d(h, w, g):
    rm = _adaptive_pool_matrix_1d(h, g)                      # (h, g)
    cm = _adaptive_pool_matrix_1d(w, g)                      # (w, g)
    return (rm[:, None, :, None] * cm[None, :, None, :]).reshape(h * w, g * g)


def _upsample_indices(out_size, in_size, scale):
    o = jnp.arange(out_size, dtype=jnp.float32)
    src = jnp.maximum((o + 0.5) / scale - 0.5, 0.0)
    i0 = jnp.minimum(jnp.floor(src).astype(jnp.int32), in_size - 1)
    i1 = jnp.minimum(i0 + 1, in_size - 1)
    w1 = src - i0.astype(jnp.float32)
    return i0, i1, w1


def _upsample_matrix_1d(in_size, scale):
    out_size = in_size * scale
    i0, i1, w1 = _upsample_indices(out_size, in_size, scale)
    rows = jnp.arange(out_size)
    m = jnp.zeros((out_size, in_size), jnp.float32)
    m = m.at[rows, i0].add(1.0 - w1)
    m = m.at[rows, i1].add(w1)
    return m                                                 # (out, in)


def _pool_after_up_matrix(h, w, scale, g):
    """Exact matrix C s.t. adaptive_pool(bilinear_up(y, scale), g) ==
    y_flat @ C, so re-pooling never touches the upsampled tensor."""
    ur = _upsample_matrix_1d(h, scale)
    uc = _upsample_matrix_1d(w, scale)
    rm = _adaptive_pool_matrix_1d(h * scale, g)
    cm = _adaptive_pool_matrix_1d(w * scale, g)
    row = ur.T @ rm                                          # (h, g)
    col = uc.T @ cm                                          # (w, g)
    return (row[:, None, :, None] * col[None, :, None, :]).reshape(h * w, g * g)


def bilinear_upsample_nhwc(x, scale):
    # TODO(synk): kept as XLA glue; fusing into the HW-tiled Pallas kernels
    # would require halo rows across tile boundaries.  Keeps x's dtype (bf16
    # intermediates between PPA stages, f32 for the final logits).
    n, h, w, c = x.shape
    dt = x.dtype
    one = jnp.asarray(1.0, dt)
    r0, r1, wr = _upsample_indices(h * scale, h, scale)
    wr = wr.astype(dt)
    x = (x[:, r0] * (one - wr)[None, :, None, None]
         + x[:, r1] * wr[None, :, None, None])
    c0, c1, wc = _upsample_indices(w * scale, w, scale)
    wc = wc.astype(dt)
    x = (x[:, :, c0] * (one - wc)[None, None, :, None]
         + x[:, :, c1] * wc[None, None, :, None])
    return x


# ---------------------------------------------------------------------------
# Kernel A: Conv2d(1x1) + per-channel sum / sum-of-squares (GroupNorm pass 1).
# ---------------------------------------------------------------------------
def _conv_stats_kernel(x_ref, w_ref, b_ref, y_ref, sum_ref, ssq_ref, *,
                       valid_rows, tile, masked):
    j = pl.program_id(1)

    @pl.when(j == 0)
    def _init():
        sum_ref[...] = jnp.zeros_like(sum_ref)
        ssq_ref[...] = jnp.zeros_like(ssq_ref)

    y = jnp.dot(x_ref[0], w_ref[...],
                preferred_element_type=jnp.float32) + b_ref[...]   # (THW, Cpad)
    if masked:                                   # zero the HW-padding rows
        rows = lax.broadcasted_iota(jnp.int32, (tile, 1), 0) + j * tile
        y = jnp.where(rows < valid_rows, y, 0.0)
    y_ref[0] = y.astype(y_ref.dtype)
    sum_ref[0] = sum_ref[0] + jnp.sum(y, axis=0, keepdims=True)
    ssq_ref[0] = ssq_ref[0] + jnp.sum(y * y, axis=0, keepdims=True)


# ---------------------------------------------------------------------------
# Kernel B: GN scale/shift + ReLU fused with adaptive-average-pool -> (P, C).
# (Only the tiny pooled patches hit HBM; no full-res normalized activation.)
# ---------------------------------------------------------------------------
def _pool_kernel(y_ref, sc_ref, sh_ref, pmt_ref, pooled_ref):
    @pl.when(pl.program_id(1) == 0)
    def _init():
        pooled_ref[...] = jnp.zeros_like(pooled_ref)

    y = y_ref[0].astype(jnp.float32)
    act = jnp.maximum(y * sc_ref[0] + sh_ref[0], 0.0).astype(jnp.bfloat16)
    pooled_ref[0] = pooled_ref[0] + jnp.dot(
        pmt_ref[...], act, preferred_element_type=jnp.float32)     # (P, Cpad)


def _gn_scale_shift(csum, cssq, gamma, beta, hw, cdim, cpad):
    n = csum.shape[0]
    cpg = cdim // GN_GROUPS
    s = csum[:, 0, :cdim].reshape(n, GN_GROUPS, cpg).sum(-1)
    q = cssq[:, 0, :cdim].reshape(n, GN_GROUPS, cpg).sum(-1)
    cnt = float(hw * cpg)
    mean = s / cnt
    var = jnp.maximum(q / cnt - mean * mean, 0.0)   # clamp: cancellation
    inv = lax.rsqrt(var + GN_EPS)
    mean_c = jnp.repeat(mean, cpg, axis=1)
    inv_c = jnp.repeat(inv, cpg, axis=1)
    scale = gamma[None, :] * inv_c
    shift = beta[None, :] - mean_c * scale
    scale = _pad_axis(scale, 1, cpad).reshape(n, 1, cpad).astype(jnp.float32)
    shift = _pad_axis(shift, 1, cpad).reshape(n, 1, cpad).astype(jnp.float32)
    return scale, shift


def channel_reduce_gn_pool(x_nchw, p, *, patch_grid):
    """Returns (y_flat (N,HWpad,Cpad) bf16 un-normalized conv output,
    gn scale (N,1,Cpad), gn shift (N,1,Cpad), pooled patches (N,P,Cpad) f32,
    (h, w))."""
    n, cin, h, wdt = x_nchw.shape
    cdim = p["w"].shape[1]
    cpad = _round_up(cdim, 128)
    hw = h * wdt
    thw, hw_pad = _hw_tiling(hw)
    nt = hw_pad // thw

    x = jnp.transpose(x_nchw, (0, 2, 3, 1)).reshape(n, hw, cin)
    x = _pad_axis(x, 1, hw_pad).astype(jnp.bfloat16)
    w_pad = _pad_axis(p["w"], 1, cpad).astype(jnp.bfloat16)
    b_pad = _pad_axis(p["b"].reshape(1, cdim), 1, cpad).astype(jnp.float32)

    kern = functools.partial(_conv_stats_kernel, valid_rows=hw, tile=thw,
                             masked=(hw_pad != hw))
    y, csum, cssq = pl.pallas_call(
        kern,
        out_shape=(jax.ShapeDtypeStruct((n, hw_pad, cpad), jnp.bfloat16),
                   jax.ShapeDtypeStruct((n, 1, cpad), jnp.float32),
                   jax.ShapeDtypeStruct((n, 1, cpad), jnp.float32)),
        grid=(n, nt),
        in_specs=[pl.BlockSpec((1, thw, cin), lambda i, j: (i, j, 0)),
                  pl.BlockSpec((cin, cpad), lambda i, j: (0, 0)),
                  pl.BlockSpec((1, cpad), lambda i, j: (0, 0))],
        out_specs=(pl.BlockSpec((1, thw, cpad), lambda i, j: (i, j, 0)),
                   pl.BlockSpec((1, 1, cpad), lambda i, j: (i, 0, 0)),
                   pl.BlockSpec((1, 1, cpad), lambda i, j: (i, 0, 0))),
        compiler_params=_cparams(("parallel", "arbitrary")),
    )(x, w_pad, b_pad)

    scale, shift = _gn_scale_shift(csum, cssq, p["gamma"], p["beta"],
                                   hw, cdim, cpad)

    npatch = patch_grid * patch_grid
    pmt = _pool_matrix_2d(h, wdt, patch_grid).T          # (P, HW) exact weights
    pmt = _pad_axis(pmt, 1, hw_pad).astype(jnp.bfloat16)

    pooled = pl.pallas_call(
        _pool_kernel,
        out_shape=jax.ShapeDtypeStruct((n, npatch, cpad), jnp.float32),
        grid=(n, nt),
        in_specs=[pl.BlockSpec((1, thw, cpad), lambda i, j: (i, j, 0)),
                  pl.BlockSpec((1, 1, cpad), lambda i, j: (i, 0, 0)),
                  pl.BlockSpec((1, 1, cpad), lambda i, j: (i, 0, 0)),
                  pl.BlockSpec((npatch, thw), lambda i, j: (0, j))],
        out_specs=pl.BlockSpec((1, npatch, cpad), lambda i, j: (i, 0, 0)),
        compiler_params=_cparams(("parallel", "arbitrary")),
    )(y, scale, shift, pmt)
    return y, scale, shift, pooled, (h, wdt)


# ---------------------------------------------------------------------------
# Kernel C: PPA layer with GN+ReLU folded in and heads batched into two
# lane-dense matmuls; optionally fuses the predictor 1x1 conv on the output.
# ---------------------------------------------------------------------------
def _ppa_kernel(y_ref, sc_ref, sh_ref, m_ref, bias_ref, u_ref, bo_ref, *rest,
                nh, ppad, apply_gn, fuse_pred):
    if fuse_pred:
        wp_ref, o_ref = rest
    else:
        (o_ref,) = rest

    y = y_ref[0].astype(jnp.float32)                       # (THW, Cpad)
    if apply_gn:
        xg = jnp.maximum(y * sc_ref[0] + sh_ref[0], 0.0)   # fused GN + ReLU
    else:
        xg = y
    xb = xg.astype(jnp.bfloat16)

    # scores for all heads at once, pixel axis lane-dense: (nh*Ppad, THW)
    s = lax.dot_general(m_ref[0], xb, (((1,), (1,)), ((), ())),
                        preferred_element_type=jnp.float32)
    s = s + bias_ref[0]                                    # (nh*Ppad, 1) bcast
    thw = s.shape[1]
    s3 = s.reshape(nh, ppad, thw)
    s3 = s3 - jnp.max(s3, axis=1, keepdims=True)
    e = jnp.exp(s3)
    a3 = e * pl.reciprocal(jnp.sum(e, axis=1, keepdims=True), approx=True)
    a2 = a3.reshape(nh * ppad, thw).astype(jnp.bfloat16)

    # all heads' value/output projection in one matmul: (THW, Cpad)
    att = lax.dot_general(a2, u_ref[0], (((0,), (0,)), ((), ())),
                          preferred_element_type=jnp.float32)
    res = xg + att + bo_ref[...]
    if fuse_pred:
        o_ref[0] = jnp.dot(res.astype(jnp.bfloat16), wp_ref[...],
                           preferred_element_type=jnp.float32).astype(o_ref.dtype)
    else:
        o_ref[0] = res.astype(o_ref.dtype)


def _ppa_precompute(pooled, p, *, nh, cpad, ppad):
    """Host-side (tiny): fold the patch K/V/Q/O projections into
    M_all = scale*Wq_h K_h^T, bias_all = scale*bq_h K_h^T, U_all = V_h Wo_h."""
    n, npatch, _ = pooled.shape
    cdim = p["wq"].shape[0]
    dh = cdim // nh
    scale = 1.0 / math.sqrt(dh)
    pk = pooled[:, :, :cdim].astype(jnp.float32) + p["pos"][None, :, :]
    wq = p["wq"].reshape(cdim, nh, dh)
    wk = p["wk"].reshape(cdim, nh, dh)
    wv = p["wv"].reshape(cdim, nh, dh)
    wo = p["wo"].reshape(nh, dh, cdim)
    bq = p["bq"].reshape(nh, dh)
    bk = p["bk"].reshape(nh, dh)
    bv = p["bv"].reshape(nh, dh)
    k = jnp.einsum("npc,chd->nhpd", pk, wk) + bk[None, :, None, :]
    v = jnp.einsum("npc,chd->nhpd", pk, wv) + bv[None, :, None, :]
    m = scale * jnp.einsum("chd,nhpd->nhpc", wq, k)          # (N, nh, P, C)
    bias = scale * jnp.einsum("hd,nhpd->nhp", bq, k)         # (N, nh, P)
    u = jnp.einsum("nhpd,hdc->nhpc", v, wo)                  # (N, nh, P, C)
    # pad patch axis to a sublane multiple and channels to 128-lane multiple
    m = _pad_axis(_pad_axis(m, 2, ppad), 3, cpad).reshape(n, nh * ppad, cpad)
    u = _pad_axis(_pad_axis(u, 2, ppad), 3, cpad).reshape(n, nh * ppad, cpad)
    bias = jnp.pad(bias, ((0, 0), (0, 0), (0, ppad - npatch)),
                   constant_values=-1e30).reshape(n, nh * ppad, 1)
    bo = _pad_axis(p["bo"].reshape(1, cdim), 1, cpad).astype(jnp.float32)
    return (m.astype(jnp.bfloat16), bias.astype(jnp.float32),
            u.astype(jnp.bfloat16), bo)


def ppa_layer(x_flat, h, w, pooled, scale_c, shift_c, p, *, num_heads,
              apply_gn, pred_w=None):
    """x_flat: (N, HW or HWpad, Cpad); pooled: (N, P, Cpad) f32.
    Returns (N, HWpad, Cout) bf16 (Cout = Cpad, or Kpad when pred_w given)."""
    n, l0, cpad = x_flat.shape
    hw = h * w
    thw, hw_pad = _hw_tiling(hw)
    if l0 < hw_pad:
        x_flat = _pad_axis(x_flat, 1, hw_pad)
    nt = hw_pad // thw

    npatch = pooled.shape[1]
    nh = num_heads
    ppad = _round_up(npatch, 8)
    m_all, bias_all, u_all, bo = _ppa_precompute(pooled, p, nh=nh, cpad=cpad,
                                                 ppad=ppad)
    if scale_c is None:
        scale_c = jnp.ones((n, 1, cpad), jnp.float32)
        shift_c = jnp.zeros((n, 1, cpad), jnp.float32)

    fuse = pred_w is not None
    cout = pred_w.shape[1] if fuse else cpad
    nhp = nh * ppad
    kern = functools.partial(_ppa_kernel, nh=nh, ppad=ppad,
                             apply_gn=apply_gn, fuse_pred=fuse)
    in_specs = [
        pl.BlockSpec((1, thw, cpad), lambda i, j: (i, j, 0)),
        pl.BlockSpec((1, 1, cpad), lambda i, j: (i, 0, 0)),
        pl.BlockSpec((1, 1, cpad), lambda i, j: (i, 0, 0)),
        pl.BlockSpec((1, nhp, cpad), lambda i, j: (i, 0, 0)),
        pl.BlockSpec((1, nhp, 1), lambda i, j: (i, 0, 0)),
        pl.BlockSpec((1, nhp, cpad), lambda i, j: (i, 0, 0)),
        pl.BlockSpec((1, cpad), lambda i, j: (0, 0)),
    ]
    args = [x_flat.astype(jnp.bfloat16), scale_c, shift_c,
            m_all, bias_all, u_all, bo]
    if fuse:
        in_specs.append(pl.BlockSpec((cpad, cout), lambda i, j: (0, 0)))
        args.append(pred_w)

    out = pl.pallas_call(
        kern,
        out_shape=jax.ShapeDtypeStruct((n, hw_pad, cout), jnp.bfloat16),
        grid=(n, nt),
        in_specs=in_specs,
        out_specs=pl.BlockSpec((1, thw, cout), lambda i, j: (i, j, 0)),
        compiler_params=_cparams(("parallel", "parallel")),
    )(*args)
    return out


def _to_spatial(x_flat, n, h, w):
    return x_flat[:, :h * w, :].reshape(n, h, w, x_flat.shape[-1])


# ---------------------------------------------------------------------------
# Full SemSegHeadPPALayer forward (inference branch: returns predictions)
# ---------------------------------------------------------------------------
def sem_seg_head_forward(features, params, *, in_features, strides,
                         common_stride, num_heads, patch_grid):
    assert len(in_features) == 4
    cdim = params["heads"][0]["reduce"]["w"].shape[1]
    cpad = _round_up(cdim, 128)
    k = params["predictor"]["w"].shape[1]
    kpad = _round_up(k, 128)
    # predictor weight padded/bf16; bias added once after summing the heads
    wp = _pad_axis(_pad_axis(params["predictor"]["w"], 0, cpad),
                   1, kpad).astype(jnp.bfloat16)

    logits_sum = None
    for i, f in enumerate(in_features):
        head = params["heads"][i]
        y, sc, sh, pooled, (h, w) = channel_reduce_gn_pool(
            features[f], head["reduce"], patch_grid=patch_grid)
        n = y.shape[0]
        hd = int(math.log2(strides[f]) - math.log2(common_stride))
        n_stage = max(1, hd)
        x_flat, apply_gn = y, True
        cur_h, cur_w = h, w
        logits = None
        for j in range(n_stage):
            last = j == n_stage - 1
            out = ppa_layer(x_flat, cur_h, cur_w, pooled, sc, sh,
                            head["ppa"][j], num_heads=num_heads,
                            apply_gn=apply_gn, pred_w=wp if last else None)
            if last:
                # predictor fused in-kernel; only k logit channels go on
                logits = _to_spatial(out, n, cur_h, cur_w)[..., :k]
                logits = logits.astype(jnp.float32)
            else:
                out_sp = _to_spatial(out, n, cur_h, cur_w)      # bf16 (N,h,w,Cpad)
                # exact pool(upsample(.)) from the LOW-res tensor
                comb = _pool_after_up_matrix(cur_h, cur_w, 2, patch_grid)
                pooled = jnp.einsum(
                    "nsc,sp->npc",
                    out_sp.reshape(n, cur_h * cur_w, cpad).astype(jnp.float32),
                    comb)
                x_sp = bilinear_upsample_nhwc(out_sp, 2)        # bf16
                cur_h, cur_w = cur_h * 2, cur_w * 2
                x_flat = x_sp.reshape(n, cur_h * cur_w, cpad)
                apply_gn = False
                sc = jnp.ones((n, 1, cpad), jnp.float32)
                sh = jnp.zeros((n, 1, cpad), jnp.float32)
        if hd > 0:
            logits = bilinear_upsample_nhwc(logits, 2)          # head's final x2
        logits_sum = logits if logits_sum is None else logits_sum + logits

    preds = logits_sum + params["predictor"]["b"].reshape(1, 1, 1, k)
    preds = bilinear_upsample_nhwc(preds, common_stride)
    return jnp.transpose(preds, (0, 3, 1, 2))                   # NCHW like torch


# ---------------------------------------------------------------------------
# Deterministic parameter construction
# ---------------------------------------------------------------------------
def _dense_init(key, shape, scale=0.1):
    return scale * jax.random.normal(key, shape, dtype=jnp.float32)


def init_reduce(key, cin, cdim):
    k1, k2 = jax.random.split(key)
    return dict(w=_dense_init(k1, (cin, cdim)),
                b=_dense_init(k2, (cdim,), 0.01),
                gamma=jnp.ones((cdim,), jnp.float32),
                beta=jnp.zeros((cdim,), jnp.float32))


def init_ppa(key, c, npatch):
    ks = jax.random.split(key, 5)
    return dict(
        wq=_dense_init(ks[0], (c, c)), bq=jnp.zeros((c,), jnp.float32),
        wk=_dense_init(ks[1], (c, c)), bk=jnp.zeros((c,), jnp.float32),
        wv=_dense_init(ks[2], (c, c)), bv=jnp.zeros((c,), jnp.float32),
        wo=_dense_init(ks[3], (c, c)), bo=jnp.zeros((c,), jnp.float32),
        pos=_dense_init(ks[4], (npatch, c), 0.02),
    )


if __name__ == "__main__":
    key = jax.random.PRNGKey(0)

    # synthetic config (small)
    N = 2
    img = 64
    conv_dims = 64                 # must be divisible by GN_GROUPS (32)
    num_classes = 5
    num_patches = 4
    patch_grid = 2                 # sqrt(num_patches)
    num_heads = 2
    common_stride = 4
    in_features = ("p2", "p3", "p4", "p5")
    strides = {"p2": 4, "p3": 8, "p4": 16, "p5": 32}
    channels = {"p2": 8, "p3": 16, "p4": 16, "p5": 32}

    keys = jax.random.split(key, 2 + len(in_features))
    features = {}
    for idx, f in enumerate(in_features):
        s = strides[f]
        features[f] = jax.random.normal(
            keys[idx], (N, channels[f], img // s, img // s), jnp.float32)

    # parameters
    pk = keys[-1]
    head_params = []
    for f in in_features:
        pk, kr = jax.random.split(pk)
        hd = int(math.log2(strides[f]) - math.log2(common_stride))
        n_ppa = max(1, hd)
        ppas = []
        for _ in range(n_ppa):
            pk, kp = jax.random.split(pk)
            ppas.append(init_ppa(kp, conv_dims, num_patches))
        head_params.append(dict(reduce=init_reduce(kr, channels[f], conv_dims),
                                ppa=ppas))
    pk, kpred = jax.random.split(pk)
    params = dict(
        heads=head_params,
        predictor=dict(w=_dense_init(kpred, (conv_dims, num_classes)),
                       b=jnp.zeros((num_classes,), jnp.float32)),
    )

    out = sem_seg_head_forward(
        features, params,
        in_features=in_features, strides=strides, common_stride=common_stride,
        num_heads=num_heads, patch_grid=patch_grid)
    out = jax.block_until_ready(out)
    assert out.shape == (N, num_classes, img, img), out.shape
    assert bool(jnp.all(jnp.isfinite(out)))
    print("KERNEL_OK")
</pallas_src>

<mosaic_0001>
module attributes {stable_mosaic.version = 11 : i64} {
  func.func @_conv_stats_kernel(%arg0: i32, %arg1: i32, %arg2: memref<1x256x8xbf16, #tpu.memory_space<vmem>>, %arg3: memref<8x128xbf16, #tpu.memory_space<vmem>>, %arg4: memref<1x128xf32, #tpu.memory_space<vmem>>, %arg5: memref<1x256x128xbf16, #tpu.memory_space<vmem>>, %arg6: memref<1x1x128xf32, #tpu.memory_space<vmem>>, %arg7: memref<1x1x128xf32, #tpu.memory_space<vmem>>) attributes {dimension_semantics = [#tpu.dimension_semantics<parallel>, #tpu.dimension_semantics<arbitrary>], iteration_bounds = array<i64: 2, 1>, scalar_prefetch = 0 : i64, scratch_operands = 0 : i64, tpu.core_type = #tpu.core_type<tc>, window_params = [{transform_indices = @transform_0, window_bounds = array<i64: 1, 256, 8>}, {pipeline_mode = #tpu.pipeline_mode<synchronous>, transform_indices = @transform_1, window_bounds = array<i64: 8, 128>}, {pipeline_mode = #tpu.pipeline_mode<synchronous>, transform_indices = @transform_2, window_bounds = array<i64: 1, 128>}, {transform_indices = @transform_3, window_bounds = array<i64: 1, 256, 128>}, {transform_indices = @transform_4, window_bounds = array<i64: 1, 1, 128>}, {transform_indices = @transform_5, window_bounds = array<i64: 1, 1, 128>}]} {
    %c0_i32 = arith.constant 0 : i32
    %0 = arith.cmpi eq, %arg1, %c0_i32 : i32
    %1 = arith.extui %0 : i1 to i32
    %c0_i32_0 = arith.constant 0 : i32
    %2 = arith.cmpi ne, %1, %c0_i32_0 : i32
    scf.if %2 {
      %cst_24 = arith.constant 0.000000e+00 : f32
      %31 = vector.broadcast %cst_24 : f32 to vector<1x1x128xf32>
      %c0_25 = arith.constant 0 : index
      %c0_26 = arith.constant 0 : index
      %c0_27 = arith.constant 0 : index
      %32 = vector.load %arg6[%c0_25, %c0_26, %c0_27] : memref<1x1x128xf32, #tpu.memory_space<vmem>>, vector<1x1x128xf32>
      tpu.vector_store %arg6[%c0_25, %c0_26, %c0_27], %31 {strides = array<i32>} : memref<1x1x128xf32, #tpu.memory_space<vmem>>, vector<1x1x128xf32>,
      %cst_28 = arith.constant 0.000000e+00 : f32
      %33 = vector.broadcast %cst_28 : f32 to vector<1x1x128xf32>
      %c0_29 = arith.constant 0 : index
      %c0_30 = arith.constant 0 : index
      %c0_31 = arith.constant 0 : index
      %34 = vector.load %arg7[%c0_29, %c0_30, %c0_31] : memref<1x1x128xf32, #tpu.memory_space<vmem>>, vector<1x1x128xf32>
      tpu.vector_store %arg7[%c0_29, %c0_30, %c0_31], %33 {strides = array<i32>} : memref<1x1x128xf32, #tpu.memory_space<vmem>>, vector<1x1x128xf32>,
    } else {
    }
    %c0 = arith.constant 0 : index
    %c0_1 = arith.constant 0 : index
    %c0_2 = arith.constant 0 : index
    %3 = vector.load %arg2[%c0, %c0_1, %c0_2] : memref<1x256x8xbf16, #tpu.memory_space<vmem>>, vector<1x256x8xbf16>
    %4 = vector.shape_cast %3 : vector<1x256x8xbf16> to vector<256x8xbf16>
    %c0_3 = arith.constant 0 : index
    %c0_4 = arith.constant 0 : index
    %5 = vector.load %arg3[%c0_3, %c0_4] : memref<8x128xbf16, #tpu.memory_space<vmem>>, vector<8x128xbf16>
    %cst = arith.constant dense<0.000000e+00> : vector<256x128xf32>
    %6 = tpu.matmul %4, %5, %cst {dimension_numbers = #tpu.dot_dimension_numbers<[1], [0], [0], [1], [0, 0, 1, 1], [], []>} : vector<256x8xbf16>, vector<8x128xbf16>, vector<256x128xf32> -> vector<256x128xf32>
    %c0_5 = arith.constant 0 : index
    %c0_6 = arith.constant 0 : index
    %7 = vector.load %arg4[%c0_5, %c0_6] : memref<1x128xf32, #tpu.memory_space<vmem>>, vector<1x128xf32>
    %8 = vector.broadcast %7 : vector<1x128xf32> to vector<256x128xf32>
    %9 = arith.addf %6, %8 : vector<256x128xf32>
    %10 = arith.truncf %9 : vector<256x128xf32> to vector<256x128xbf16>
    %c0_7 = arith.constant 0 : index
    %c0_8 = arith.constant 0 : index
    %c0_9 = arith.constant 0 : index
    %11 = vector.load %arg5[%c0_7, %c0_8, %c0_9] : memref<1x256x128xbf16, #tpu.memory_space<vmem>>, vector<1x256x128xbf16>
    %12 = vector.shape_cast %11 : vector<1x256x128xbf16> to vector<256x128xbf16>
    %13 = vector.shape_cast %10 : vector<256x128xbf16> to vector<1x256x128xbf16>
    tpu.vector_store %arg5[%c0_7, %c0_8, %c0_9], %13 {strides = array<i32>} : memref<1x256x128xbf16, #tpu.memory_space<vmem>>, vector<1x256x128xbf16>,
    %c0_10 = arith.constant 0 : index
    %c0_11 = arith.constant 0 : index
    %c0_12 = arith.constant 0 : index
    %14 = vector.load %arg6[%c0_10, %c0_11, %c0_12] : memref<1x1x128xf32, #tpu.memory_space<vmem>>, vector<1x1x128xf32>
    %15 = vector.shape_cast %14 : vector<1x1x128xf32> to vector<1x128xf32>
    %cst_13 = arith.constant dense<0.000000e+00> : vector<128xf32>
    %16 = vector.multi_reduction <add>, %9, %cst_13 [0] : vector<256x128xf32> to vector<128xf32>
    %17 = vector.shape_cast %16 : vector<128xf32> to vector<1x128xf32>
    %18 = arith.addf %15, %17 : vector<1x128xf32>
    %c0_14 = arith.constant 0 : index
    %c0_15 = arith.constant 0 : index
    %c0_16 = arith.constant 0 : index
    %19 = vector.load %arg6[%c0_14, %c0_15, %c0_16] : memref<1x1x128xf32, #tpu.memory_space<vmem>>, vector<1x1x128xf32>
    %20 = vector.shape_cast %19 : vector<1x1x128xf32> to vector<1x128xf32>
    %21 = vector.shape_cast %18 : vector<1x128xf32> to vector<1x1x128xf32>
    tpu.vector_store %arg6[%c0_14, %c0_15, %c0_16], %21 {strides = array<i32>} : memref<1x1x128xf32, #tpu.memory_space<vmem>>, vector<1x1x128xf32>,
    %c0_17 = arith.constant 0 : index
    %c0_18 = arith.constant 0 : index
    %c0_19 = arith.constant 0 : index
    %22 = vector.load %arg7[%c0_17, %c0_18, %c0_19] : memref<1x1x128xf32, #tpu.memory_space<vmem>>, vector<1x1x128xf32>
    %23 = vector.shape_cast %22 : vector<1x1x128xf32> to vector<1x128xf32>
    %24 = arith.mulf %9, %9 : vector<256x128xf32>
    %cst_20 = arith.constant dense<0.000000e+00> : vector<128xf32>
    %25 = vector.multi_reduction <add>, %24, %cst_20 [0] : vector<256x128xf32> to vector<128xf32>
    %26 = vector.shape_cast %25 : vector<128xf32> to vector<1x128xf32>
    %27 = arith.addf %23, %26 : vector<1x128xf32>
    %c0_21 = arith.constant 0 : index
    %c0_22 = arith.constant 0 : index
    %c0_23 = arith.constant 0 : index
    %28 = vector.load %arg7[%c0_21, %c0_22, %c0_23] : memref<1x1x128xf32, #tpu.memory_space<vmem>>, vector<1x1x128xf32>
    %29 = vector.shape_cast %28 : vector<1x1x128xf32> to vector<1x128xf32>
    %30 = vector.shape_cast %27 : vector<1x128xf32> to vector<1x1x128xf32>
    tpu.vector_store %arg7[%c0_21, %c0_22, %c0_23], %30 {strides = array<i32>} : memref<1x1x128xf32, #tpu.memory_space<vmem>>, vector<1x1x128xf32>,
    return
  }
  func.func @transform_0(%arg0: i32, %arg1: i32) -> (i32, i32, i32) {
    %c0_i32 = arith.constant 0 : i32
    %c0_i32_0 = arith.constant 0 : i32
    return %arg0, %arg1, %c0_i32 : i32, i32, i32
  }
  func.func @transform_1(%arg0: i32, %arg1: i32) -> (i32, i32) {
    %c0_i32 = arith.constant 0 : i32
    %c0_i32_0 = arith.constant 0 : i32
    %c0_i32_1 = arith.constant 0 : i32
    return %c0_i32, %c0_i32_0 : i32, i32
  }
  func.func @transform_2(%arg0: i32, %arg1: i32) -> (i32, i32) {
    %c0_i32 = arith.constant 0 : i32
    %c0_i32_0 = arith.constant 0 : i32
    %c0_i32_1 = arith.constant 0 : i32
    return %c0_i32, %c0_i32_0 : i32, i32
  }
  func.func @transform_3(%arg0: i32, %arg1: i32) -> (i32, i32, i32) {
    %c0_i32 = arith.constant 0 : i32
    %c0_i32_0 = arith.constant 0 : i32
    return %arg0, %arg1, %c0_i32 : i32, i32, i32
  }
  func.func @transform_4(%arg0: i32, %arg1: i32) -> (i32, i32, i32) {
    %c0_i32 = arith.constant 0 : i32
    %c0_i32_0 = arith.constant 0 : i32
    %c0_i32_1 = arith.constant 0 : i32
    return %arg0, %c0_i32, %c0_i32_0 : i32, i32, i32
  }
  func.func @transform_5(%arg0: i32, %arg1: i32) -> (i32, i32, i32) {
    %c0_i32 = arith.constant 0 : i32
    %c0_i32_0 = arith.constant 0 : i32
    %c0_i32_1 = arith.constant 0 : i32
    return %arg0, %c0_i32, %c0_i32_0 : i32, i32, i32
  }
}

</mosaic_0001>

<bundles_post_ra>
// kernel: tpu_custom_call.1
= control target key start
LH: loop header
LB: loop body
LE: loop exit
PB: predicated region body
PF: predicated region fallthrough
CT: control target
= control target key end

     0   :  { %11 = vsyncpa [#allocation3], 0  ;;  %s1982_s0 = inlined_call_operand.vmem [shape: bf16[2,256,8], index: 0, kind: input, shape index: {}]   ;;  %s1983_s1 = inlined_call_operand.vmem [shape: bf16[8,128], index: 1, kind: input, shape index: {}]   ;;  %s1984_s2 = inlined_call_operand.vmem [shape: f32[1,128], index: 2, kind: input, shape index: {}]   ;;  %s1985_s3 = inlined_call_operand.hbm [shape: bf16[2,256,128], index: 3, kind: output, shape index: {0}]   ;;  %s1986_s4 = inlined_call_operand.hbm [shape: f32[2,1,128], index: 4, kind: output, shape index: {1}]   ;;  %s1987_s5 = inlined_call_operand.hbm [shape: f32[2,1,128], index: 5, kind: output, shape index: {2}]  }
   0x1   :  { %13 = vsyncpa [#allocation3 + $0x1], 0 }
   0x2   :  { %14 = vsyncpa [#allocation5], 0 }
   0x3   :  { %16 = vsyncpa [#allocation5 + $0x1], 0  ;;  %s1589_s18 = smov 0   ;;  %s1591_s19 = smov 0  }
   0x4   :  { %s1593_s20 = smov 0   ;;  %s1595_s21 = smov 0  }
   0x5   :  { %s1597_s22 = smov 0   ;;  %s1599_s23 = smov 0  }
   0x6 LB: > { %s1065_s24 = sadd.s32 4294967295, %s1551_s23   ;;  %s1988_s25 = sadd.s32 4294967294, %s1551_s23   ;;  %s1551_s23 = sphi %s1599_s23, %s22_s23   ;;  %s1547_s22 = sphi %s1597_s22, %s1996_s22   ;;  %s1543_s21 = sphi %s1595_s21, %s1995_s21   ;;  %s1539_s20 = sphi %s1593_s20, %s1994_s20   ;;  %s1535_s19 = sphi %s1591_s19, %s1993_s19   ;;  %s1531_s18 = sphi %s1589_s18, %s1992_s18  }
   0x7   : > { %s34_s26 = sadd.s32 1, %s1547_s22  ;;  %s113_s27 = sadd.s32 1, %s1539_s20 }
   0x8   : > { %p36_p0 = scmp.ge.s32.totalorder %s34_s26, 2  ;;  %p123_p1 = scmp.ne.s32.totalorder %s1539_s20, %s1535_s19 }
   0x9   : > { %p124_p2 = scmp.eq.s32.totalorder %s1065_s24, 1  ;;  %p129_p3 = scmp.ne.s32.totalorder %s1535_s19, %s1531_s18 }
   0xa   : > { %s1998_s26 = smov (%p36_p0, %s34_s26), 0  ;;  %p130_p5 = scmp.eq.s32.totalorder %s1988_s25, 1 }
   0xb   : > { %p1631_p4 = por %p124_p2, %p123_p1  ;;  %s108_s29 = ssub.s32 %s1547_s22, %s1998_s26 }
   0xc   : > { %p1069_p6 = scmp.ge.s32.totalorder %s1551_s23, 1  ;;  %p111_p7 = scmp.eq.s32.totalorder %s108_s29, 0 }
   0xd   : > { %p1640_p8 = por %p130_p5, %p129_p3  ;;  %p219_p9 = scmp.lt.s32.totalorder %s1551_s23, 3 }
   0xe   : > { %s1646_s6 = scalar_select %p111_p7, %s1539_s20, %s113_s27  }
   0xf   : > { %p220_p10 = pnand %p1069_p6, %p219_p9 }
  0x10   : > { %v309_v0 = vld [vmem:[%s1983_s1] sm:$0xf] (!%p220_p10)  ;;  %vm446_vm0 = vcmask (!%p220_p10), 1043456   ;;  %p260_p11 = scmp.lt.s32.totalorder (!%p220_p10), %s1543_s21, 1  ;;  %vm397_vm1 = vcmask (!%p220_p10), 64512   ;;  %s1691_s14 = sand.u32 (!%p220_p10), 1, %s1535_s19  }
  0x11   : > { %223 = sbr.rel (%p220_p10) target bundleno = 370 (0x172), region = 32  ;;  %1327 = vmatprep.subr.msk.bf16.mxu0 (!%p220_p10), %vm446_vm0, %v309_v0  ;;  %v448_v1 = vsel (!%p220_p10), %vm446_vm0, %v309_v0, 0  ;;  %1328 = vmatprep.subr.msk.bf16.mxu1 (!%p220_p10), %vm446_vm0, %v309_v0  ;;  %s1694_s15 = scalar_lea.vmem (!%p220_p10), [#allocation4], %s1691_s14  ;;  %v1553_v18 = vmov (!%p220_p10), 0.0   ;;  %v1704_v19 = vld [vmem:[%s1984_s2] ss:$0 sm:$0xff] (!%p220_p10) }
  0x12   : > { %1292 = vmatpush3.bf16.msra.mxu0 (!%p220_p10), %v448_v1  ;;  %1326 = vmatpush3.bf16.msra.mxu1 (!%p220_p10), %v448_v1  ;;  %275 = vst [vmem:[%s1694_s15] sm:$0x1] (!%p220_p10), %v1553_v18  ;;  %s1698_s16 = scalar_lea.vmem (!%p220_p10), [#allocation6], %s1691_s14  ;;  %s1070_s29 = sshll.u32 (!%p220_p10), %s1691_s14, 7 }
  0x13   : > { %276 = vst [vmem:[%s1698_s16] sm:$0x1] (!%p220_p10), %v1553_v18  ;;  %s1711_s7 = scalar_lea.vmem (!%p220_p10), [#allocation2], %s1070_s29  ;;  %s1178_s8 = sshll.u32 (!%p220_p10), %s1543_s21, 11 }
  0x14   : > { %s1809_s12 = scalar_lea.hbm (!%p220_p10), %s1985_s3, %s1178_s8  ;;  %s1554_s27 = smov (!%p220_p10), [#allocation2]  }
  0x15   : > { %s1417_s29 = sshll.u32 (!%p220_p10), %s1554_s27, 4  ;;  %s1418_s29 = int_to_ptr.vmem [resolvable:$false] %s1417_s29 }
  0x16   : > { %s1419_s8 = scalar_lea.vmem (!%p220_p10), %s1418_s29, 4096 }
  0x18   : > { %s261_s9 = scalar_select %p260_p11, %s1543_s21, 1 }
  0x1a   : > { %s1145_s10 = sshll.u32 %s261_s9, 7  ;;  %s907_s9 = sshll.u32 %s1711_s7, 4  ;;  %s1811_s9 = int_to_ptr.vmem [resolvable:$true] %s907_s9 }
  0x1b   : > { %s1656_s13 = scalar_lea.vmem %s1982_s0, %s1145_s10  ;;  %s1413_s17 = scalar_lea.vmem %s1811_s9, 2048 }
  0x1c   : > { %v1397_v2 = vld [vmem:[%s1656_s13] sm:$0xff]   ;;  %v1398_v3 = vld [vmem:[%s1656_s13 + $0x8] sm:$0xff]   ;;  %v1399_v4 = vld [vmem:[%s1656_s13 + $0x10] sm:$0xff]   ;;  %p1414_p12 = scmp.ne.s32.totalorder %s1811_s9, %s1413_s17  ;;  %p1420_p1 = scmp.lt.s32.totalorder %s1811_s9, %s1418_s29 }
  0x1d   : > { %1293 = vmatprep.mubr.msk.bf16.mxu0 %vm397_vm1, %v1397_v2  ;;  %v1400_v5 = vld [vmem:[%s1656_s13 + $0x18] sm:$0xff]   ;;  %v1401_v6 = vld [vmem:[%s1656_s13 + $0x20] sm:$0xff]   ;;  %v1406_v8 = vld [vmem:[%s1656_s13 + $0x48] sm:$0xff]   ;;  %p1421_p2 = scmp.lt.s32.totalorder %s1419_s8, %s1413_s17 }
  0x1e   : > { %1294 = vmatmul.mubr.msk.bf16.vlgmr.msra.gmra.mrb[0].mxu0 %vm397_vm1, %v1398_v3  ;;  %v1405_v7 = vld [vmem:[%s1656_s13 + $0x40] sm:$0xff]   ;;  %v1407_v9 = vld [vmem:[%s1656_s13 + $0x50] sm:$0xff]   ;;  %v1402_v10 = vld [vmem:[%s1656_s13 + $0x28] sm:$0xff]   ;;  %p1415_p13 = pnand %p1414_p12, %p1631_p4 }
  0x1f   : > { %1297 = vmatprep.mubr.msk.bf16.mxu0 %vm397_vm1, %v1399_v4  ;;  %1309 = vmatprep.mubr.msk.bf16.mxu1 %vm397_vm1, %v1405_v7  ;;  %v1408_v11 = vld [vmem:[%s1656_s13 + $0x58] sm:$0xff]   ;;  %v1403_v12 = vld [vmem:[%s1656_s13 + $0x30] sm:$0xff]   ;;  %v1409_v13 = vld [vmem:[%s1656_s13 + $0x60] sm:$0xff]   ;;  %p1422_p3 = por %p1421_p2, %p1420_p1 }
  0x20   : > { %1310 = vmatmul.mubr.msk.bf16.vlgmr.msra.gmra.mrb[0].mxu1 %vm397_vm1, %v1406_v8  ;;  %v1404_v14 = vld [vmem:[%s1656_s13 + $0x38] sm:$0xff]   ;;  %v1410_v15 = vld [vmem:[%s1656_s13 + $0x68] sm:$0xff]   ;;  %v1411_v16 = vld [vmem:[%s1656_s13 + $0x70] sm:$0xff]   ;;  %p1416_p0 = pneg %p1415_p13 }
  0x21   : > { %1313 = vmatprep.mubr.msk.bf16.mxu1 %vm397_vm1, %v1407_v9  ;;  %v1412_v17 = vld [vmem:[%s1656_s13 + $0x78] sm:$0xff]   ;;  %s884_s13 = scalar_lea.sflag [#allocation3], %s1691_s14 }
  0x22   : > { %p1423_p5 = pnand %p1422_p3, %p1416_p0 }
  0x26   : > { %1298 = vmatmul.mubr.msk.bf16.gmra.mrb[4].mxu0 %vm397_vm1, %v1400_v5 }
  0x27   : > { %1301 = vmatprep.mubr.msk.bf16.mxu0 %vm397_vm1, %v1401_v6 }
  0x28   : > { %1314 = vmatmul.mubr.msk.bf16.gmra.mrb[4].mxu1 %vm397_vm1, %v1408_v11 }
  0x29   : > { %1317 = vmatprep.mubr.msk.bf16.mxu1 %vm397_vm1, %v1409_v13 }
  0x2e   : > { %1302 = vmatmul.mubr.msk.bf16.gmra.mrb[8].mxu0 %vm397_vm1, %v1402_v10 }
  0x2f   : > { %1305 = vmatprep.mubr.msk.bf16.mxu0 %vm397_vm1, %v1403_v12 }
  0x30   : > { %1318 = vmatmul.mubr.msk.bf16.gmra.mrb[8].mxu1 %vm397_vm1, %v1410_v15 }
  0x31   : > { %1321 = vmatprep.mubr.msk.bf16.mxu1 %vm397_vm1, %v1411_v16 }
  0x36   : > { %1306 = vmatmul.mubr.msk.bf16.gmra.mrb[12].mxu0 %vm397_vm1, %v1404_v14 }
  0x38   : > { %1322 = vmatmul.mubr.msk.bf16.gmra.mrb[12].mxu1 %vm397_vm1, %v1412_v17 }
  0xf1   : > { %v1295_v20 = vpop.f32.mrb[0].mxu0 }
  0xf2   : > { %v484_v21 = vpop.f32.mrb[1].mxu0  ;;  %v493_v24 = vadd.f32 %v1295_v20, %v1704_v19 }
  0xf3   : > { %v485_v22 = vadd.f32 %v1704_v19, %v484_v21  ;;  %v1296_v23 = vpop.f32.mrb[2].mxu0  ;;  %v1311_v37 = vpop.f32.mrb[0].mxu1 }
  0xf4   : > { %v496_v25 = vadd.f32 %v1296_v23, %v1704_v19  ;;  %v487_v26 = vpop.f32.mrb[3].mxu0  ;;  %v814_v33 = vmul.f32 %v493_v24, %v493_v24  ;;  %v1716_v39 = vadd.f32 %v1311_v37, %v1704_v19  ;;  %v548_v40 = vpop.f32.mrb[1].mxu1 }
  0xf5   : > { %v488_v27 = vadd.f32 %v1704_v19, %v487_v26  ;;  %v812_v29 = vmul.f32 %v485_v22, %v485_v22  ;;  %v1312_v46 = vpop.f32.mrb[2].mxu1  ;;  %v1726_v57 = vadd.f32 %v1704_v19, %v548_v40 }
  0xf6   : > { %v1187_v28 = vpack.c.bf16 %v496_v25, %v493_v24  ;;  %v815_v41 = vmul.f32 %v496_v25, %v496_v25  ;;  %v1722_v50 = vadd.f32 %v1312_v46, %v1704_v19  ;;  %v551_v51 = vpop.f32.mrb[3].mxu1 }
  0xf7   : > { %v1182_v30 = vpack.c.bf16 %v488_v27, %v485_v22  ;;  %v772_v31 = vadd.f32 %v488_v27, %v485_v22  ;;  %v813_v32 = vmul.f32 %v488_v27, %v488_v27  ;;  %v1733_v63 = vadd.f32 %v1704_v19, %v551_v51 }
  0xf8   : > { %1259 = vst [vmem:[%s1711_s7 + $0x8] sm:$0xff] %v1187_v28   ;;  %v1227_v58 = vpack.c.bf16 %v1722_v50, %v1716_v39 }
  0xf9   : > { %1183 = vst [vmem:[%s1711_s7] sm:$0xff] %v1182_v30   ;;  %v773_v34 = vadd.f32 %v772_v31, %v493_v24  ;;  %v844_v35 = vadd.f32 %v813_v32, %v812_v29  ;;  %v1299_v36 = vpop.f32.mrb[4].mxu0  ;;  %v1222_v6 = vpack.c.bf16 %v1733_v63, %v1726_v57 }
  0xfa   : > { %v500_v38 = vpop.f32.mrb[5].mxu0  ;;  %v509_v47 = vadd.f32 %v1299_v36, %v1704_v19  ;;  %1267 = vst [vmem:[%s1711_s7 + $0x48] sm:$0xff] %v1227_v58  }
  0xfb   : > { %v845_v42 = vadd.f32 %v844_v35, %v814_v33  ;;  %v501_v43 = vadd.f32 %v1704_v19, %v500_v38  ;;  %v774_v44 = vadd.f32 %v773_v34, %v496_v25  ;;  %v1300_v45 = vpop.f32.mrb[6].mxu0  ;;  %v1315_v4 = vpop.f32.mrb[4].mxu1  ;;  %1266 = vst [vmem:[%s1711_s7 + $0x40] sm:$0xff] %v1222_v6  }
  0xfc   : > { %v512_v48 = vadd.f32 %v1300_v45, %v1704_v19  ;;  %v503_v49 = vpop.f32.mrb[7].mxu0  ;;  %v818_v0 = vmul.f32 %v509_v47, %v509_v47  ;;  %v1739_v7 = vadd.f32 %v1315_v4, %v1704_v19  ;;  %v564_v8 = vpop.f32.mrb[5].mxu1 }
  0xfd   : > { %v775_v52 = vadd.f32 %v774_v44, %v501_v43  ;;  %v816_v53 = vmul.f32 %v501_v43, %v501_v43  ;;  %v846_v54 = vadd.f32 %v845_v42, %v815_v41  ;;  %v504_v55 = vadd.f32 %v1704_v19, %v503_v49  ;;  %v1316_v14 = vpop.f32.mrb[6].mxu1 }
  0xfe   : > { %v1197_v56 = vpack.c.bf16 %v512_v48, %v509_v47  ;;  %v819_v9 = vmul.f32 %v512_v48, %v512_v48  ;;  %v1746_v18 = vadd.f32 %v1316_v14, %v1704_v19  ;;  %v567_v20 = vpop.f32.mrb[7].mxu1  ;;  %v1750_v26 = vadd.f32 %v1704_v19, %v564_v8 }
  0xff   : > { %v847_v59 = vadd.f32 %v846_v54, %v816_v53  ;;  %v1192_v60 = vpack.c.bf16 %v504_v55, %v501_v43  ;;  %v776_v61 = vadd.f32 %v775_v52, %v504_v55  ;;  %v817_v62 = vmul.f32 %v504_v55, %v504_v55 }
 0x100   : > { %1261 = vst [vmem:[%s1711_s7 + $0x18] sm:$0xff] %v1197_v56   ;;  %v1237_v27 = vpack.c.bf16 %v1746_v18, %v1739_v7  ;;  %v1757_v32 = vadd.f32 %v1704_v19, %v567_v20 }
 0x101   : > { %1260 = vst [vmem:[%s1711_s7 + $0x10] sm:$0xff] %v1192_v60   ;;  %v777_v1 = vadd.f32 %v776_v61, %v509_v47  ;;  %v848_v2 = vadd.f32 %v847_v59, %v817_v62  ;;  %v1303_v3 = vpop.f32.mrb[8].mxu0 }
 0x102   : > { %v516_v5 = vpop.f32.mrb[9].mxu0  ;;  %v525_v15 = vadd.f32 %v1303_v3, %v1704_v19  ;;  %1269 = vst [vmem:[%s1711_s7 + $0x58] sm:$0xff] %v1237_v27   ;;  %v1232_v40 = vpack.c.bf16 %v1757_v32, %v1750_v26 }
 0x103   : > { %v849_v10 = vadd.f32 %v848_v2, %v818_v0  ;;  %v517_v11 = vadd.f32 %v1704_v19, %v516_v5  ;;  %v778_v12 = vadd.f32 %v777_v1, %v512_v48  ;;  %v1304_v13 = vpop.f32.mrb[10].mxu0  ;;  %v1319_v37 = vpop.f32.mrb[8].mxu1 }
 0x104   : > { %v528_v16 = vadd.f32 %v1304_v13, %v1704_v19  ;;  %v519_v17 = vpop.f32.mrb[11].mxu0  ;;  %v822_v33 = vmul.f32 %v525_v15, %v525_v15  ;;  %v1763_v41 = vadd.f32 %v1319_v37, %v1704_v19  ;;  %v580_v42 = vpop.f32.mrb[9].mxu1  ;;  %1268 = vst [vmem:[%s1711_s7 + $0x50] sm:$0xff] %v1232_v40  }
 0x105   : > { %v779_v21 = vadd.f32 %v778_v12, %v517_v11  ;;  %v820_v22 = vmul.f32 %v517_v11, %v517_v11  ;;  %v850_v23 = vadd.f32 %v849_v10, %v819_v9  ;;  %v520_v24 = vadd.f32 %v1704_v19, %v519_v17  ;;  %v1320_v48 = vpop.f32.mrb[10].mxu1 }
 0x106   : > { %v1207_v25 = vpack.c.bf16 %v528_v16, %v525_v15  ;;  %v823_v43 = vmul.f32 %v528_v16, %v528_v16  ;;  %v1770_v53 = vadd.f32 %v1320_v48, %v1704_v19  ;;  %v583_v54 = vpop.f32.mrb[11].mxu1  ;;  %v1774_v61 = vadd.f32 %v1704_v19, %v580_v42 }
 0x107   : > { %v851_v28 = vadd.f32 %v850_v23, %v820_v22  ;;  %v1202_v29 = vpack.c.bf16 %v520_v24, %v517_v11  ;;  %v780_v30 = vadd.f32 %v779_v21, %v520_v24  ;;  %v821_v31 = vmul.f32 %v520_v24, %v520_v24 }
 0x108   : > { %1263 = vst [vmem:[%s1711_s7 + $0x28] sm:$0xff] %v1207_v25   ;;  %v1247_v62 = vpack.c.bf16 %v1770_v53, %v1763_v41  ;;  %v1781_v4 = vadd.f32 %v1704_v19, %v583_v54  ;;  %v828_v10 = vmul.f32 %v1726_v57, %v1726_v57 }
 0x109   : > { %1262 = vst [vmem:[%s1711_s7 + $0x20] sm:$0xff] %v1202_v29   ;;  %v781_v34 = vadd.f32 %v780_v30, %v525_v15  ;;  %v852_v35 = vadd.f32 %v851_v28, %v821_v31  ;;  %v1307_v36 = vpop.f32.mrb[12].mxu0  ;;  %v830_v30 = vmul.f32 %v1716_v39, %v1716_v39 }
 0x10a   : > { %v532_v38 = vpop.f32.mrb[13].mxu0  ;;  %v541_v49 = vadd.f32 %v1307_v36, %v1704_v19  ;;  %1271 = vst [vmem:[%s1711_s7 + $0x68] sm:$0xff] %v1247_v62   ;;  %v1242_v11 = vpack.c.bf16 %v1781_v4, %v1774_v61 }
 0x10b   : > { %v853_v44 = vadd.f32 %v852_v35, %v822_v33  ;;  %v533_v45 = vadd.f32 %v1704_v19, %v532_v38  ;;  %v782_v46 = vadd.f32 %v781_v34, %v528_v16  ;;  %v1308_v47 = vpop.f32.mrb[14].mxu0  ;;  %v1323_v9 = vpop.f32.mrb[12].mxu1 }
 0x10c   : > { %v544_v51 = vadd.f32 %v1308_v47, %v1704_v19  ;;  %v535_v52 = vpop.f32.mrb[15].mxu0  ;;  %v826_v5 = vmul.f32 %v541_v49, %v541_v49  ;;  %v1789_v12 = vadd.f32 %v1323_v9, %v1704_v19  ;;  %v596_v13 = vpop.f32.mrb[13].mxu1  ;;  %1270 = vst [vmem:[%s1711_s7 + $0x60] sm:$0xff] %v1242_v11  }
 0x10d   : > { %v783_v55 = vadd.f32 %v782_v46, %v533_v45  ;;  %v824_v56 = vmul.f32 %v533_v45, %v533_v45  ;;  %v854_v58 = vadd.f32 %v853_v44, %v823_v43  ;;  %v536_v59 = vadd.f32 %v1704_v19, %v535_v52  ;;  %v1324_v20 = vpop.f32.mrb[14].mxu1 }
 0x10e   : > { %v1217_v60 = vpack.c.bf16 %v544_v51, %v541_v49  ;;  %v827_v14 = vmul.f32 %v544_v51, %v544_v51  ;;  %v1792_v17 = vadd.f32 %v1704_v19, %v596_v13  ;;  %v1798_v21 = vadd.f32 %v1324_v20, %v1704_v19  ;;  %v599_v22 = vpop.f32.mrb[15].mxu1 }
 0x10f   : > { %v855_v0 = vadd.f32 %v854_v58, %v824_v56  ;;  %v1212_v1 = vpack.c.bf16 %v536_v59, %v533_v45  ;;  %v784_v2 = vadd.f32 %v783_v55, %v536_v59  ;;  %v825_v3 = vmul.f32 %v536_v59, %v536_v59 }
 0x110   : > { %1265 = vst [vmem:[%s1711_s7 + $0x38] sm:$0xff] %v1217_v60   ;;  %v1802_v25 = vadd.f32 %v1704_v19, %v599_v22  ;;  %v1257_v27 = vpack.c.bf16 %v1798_v21, %v1789_v12  ;;  %v829_v19 = vmul.f32 %v1733_v63, %v1733_v63 }
 0x111   : > { %1264 = vst [vmem:[%s1711_s7 + $0x30] sm:$0xff] %v1212_v1   ;;  %v785_v6 = vadd.f32 %v784_v2, %v541_v49  ;;  %v856_v8 = vadd.f32 %v855_v0, %v825_v3 }
 0x112   : > { %v1252_v29 = vpack.c.bf16 %v1802_v25, %v1792_v17  ;;  %1273 = vst [vmem:[%s1711_s7 + $0x78] sm:$0xff] %v1257_v27  }
 0x113   : > { %v857_v15 = vadd.f32 %v856_v8, %v826_v5  ;;  %v786_v16 = vadd.f32 %v785_v6, %v544_v51 }
 0x114   : > { %1272 = vst [vmem:[%s1711_s7 + $0x70] sm:$0xff] %v1252_v29  }
 0x115   : > { %v787_v23 = vadd.f32 %v786_v16, %v1726_v57  ;;  %v858_v24 = vadd.f32 %v857_v15, %v827_v14 }
 0x117   : > { %v859_v28 = vadd.f32 %v858_v24, %v828_v10  ;;  %v788_v57 = vadd.f32 %v787_v23, %v1733_v63 }
 0x119   : > { %v789_v31 = vadd.f32 %v788_v57, %v1716_v39  ;;  %v860_v33 = vadd.f32 %v859_v28, %v829_v19 }
 0x11a   : > { %1426 = shalt.err (!%p1423_p5)
}
 0x11b   : > { %s1427_s7 = scalar_lea.hbm %s1809_s12, 2048  ;;  %s1431_s27 = scalar_lea.hbm %s1985_s3, 4096 }
 0x11c   : > { %p1428_p6 = scmp.ne.s32.totalorder %s1809_s12, %s1427_s7  ;;  %p1432_p10 = scmp.lt.u32.totalorder %s1809_s12, %s1985_s3 }
 0x11d   : > { %p1433_p11 = scmp.lt.u32.totalorder %s1431_s27, %s1427_s7  ;;  %p1435_p13 = scmp.lt.u32.totalorder %s1427_s7, %s1809_s12 }
 0x11e   : > { %p1429_p7 = pnand %p1428_p6, %p1631_p4 }
 0x11f   : > { %p1434_p12 = por %p1433_p11, %p1432_p10 }
 0x120   : > { %p1430_p9 = pneg %p1429_p7 }
 0x121   : > { %p1436_p0 = por %p1435_p13, %p1434_p12 }
 0x123   : > { %p1437_p1 = pnand %p1436_p0, %p1430_p9 }
 0x125   : > { %1440 = shalt.err (!%p1437_p1)
}
 0x126   : > { %s1555_s17 = smov 64   ;;  %s1556_s8 = smov 4   ;;  %v831_v39 = vmul.f32 %v1722_v50, %v1722_v50  ;;  %v861_v63 = vadd.f32 %v860_v33, %v830_v30  ;;  %v790_v34 = vadd.f32 %v789_v31, %v1722_v50  ;;  %v832_v35 = vmul.f32 %v1750_v26, %v1750_v26  ;;  %v811_v22 = vld [vmem:[%s1698_s16] sm:$0x1] }
 0x127   : > { %1329 = dma.vmem_to_hbm [thread:$0]  (%p1631_p4), %s1811_s9, 2048, %s1809_s12, %s884_s13, %s1555_s17, %s1555_s17, %s1556_s8   ;;  %v833_v42 = vmul.f32 %v1757_v32, %v1757_v32  ;;  %v834_v43 = vmul.f32 %v1739_v7, %v1739_v7  ;;  %v835_v50 = vmul.f32 %v1746_v18, %v1746_v18  ;;  %v837_v52 = vmul.f32 %v1781_v4, %v1781_v4 }
 0x128   : > { %v791_v36 = vadd.f32 %v790_v34, %v1750_v26  ;;  %v862_v37 = vadd.f32 %v861_v63, %v831_v39  ;;  %v836_v26 = vmul.f32 %v1774_v61, %v1774_v61  ;;  %v840_v59 = vmul.f32 %v1792_v17, %v1792_v17  ;;  %s1888_s25 = sand.u32 1, %s1065_s24   ;;  %s1141_s14 = sshll.u32 %s1543_s21, 4 }
 0x129   : > { %v841_v1 = vmul.f32 %v1802_v25, %v1802_v25  ;;  %v843_v3 = vmul.f32 %v1798_v21, %v1798_v21  ;;  %s923_s9 = sshll.u32 %s1694_s15, 4  ;;  %s936_s12 = sshll.u32 %s1698_s16, 4  ;;  %s1900_s9 = int_to_ptr.vmem [resolvable:$true] %s923_s9  ;;  %s1908_s12 = int_to_ptr.vmem [resolvable:$true] %s936_s12 }
 0x12a   : > { %v863_v38 = vadd.f32 %v862_v37, %v832_v35  ;;  %v792_v40 = vadd.f32 %v791_v36, %v1757_v32  ;;  %s1898_s10 = scalar_lea.hbm %s1986_s4, %s1141_s14  ;;  %s1906_s11 = scalar_lea.hbm %s1987_s5, %s1141_s14 }
 0x12b   : > { %s889_s27 = scalar_lea.sflag [#allocation5], %s1888_s25  ;;  %s1441_s29 = scalar_lea.vmem %s1900_s9, 16 }
 0x12c   : > { %v793_v44 = vadd.f32 %v792_v40, %v1739_v7  ;;  %v864_v45 = vadd.f32 %v863_v38, %v833_v42  ;;  %v838_v7 = vmul.f32 %v1763_v41, %v1763_v41  ;;  %p1442_p2 = scmp.ne.s32.totalorder %s1900_s9, %s1441_s29  ;;  %s1557_s17 = smov [#allocation4]  }
 0x12d   : > { %s1445_s8 = sshll.u32 %s1557_s17, 4  ;;  %s1446_s8 = int_to_ptr.vmem [resolvable:$false] %s1445_s8 }
 0x12e   : > { %v865_v46 = vadd.f32 %v864_v45, %v834_v43  ;;  %v794_v47 = vadd.f32 %v793_v44, %v1746_v18  ;;  %v839_v18 = vmul.f32 %v1770_v53, %v1770_v53  ;;  %p1443_p3 = pnand %p1442_p2, %p1631_p4  ;;  %s1447_s13 = scalar_lea.vmem %s1446_s8, 32 }
 0x12f   : > { %p1448_p6 = scmp.lt.s32.totalorder %s1900_s9, %s1446_s8  ;;  %p1449_p7 = scmp.lt.s32.totalorder %s1447_s13, %s1441_s29 }
 0x130   : > { %v795_v48 = vadd.f32 %v794_v47, %v1774_v61  ;;  %v866_v49 = vadd.f32 %v865_v46, %v835_v50  ;;  %p1444_p5 = pneg %p1443_p3 }
 0x131   : > { %p1450_p9 = por %p1449_p7, %p1448_p6 }
 0x132   : > { %v867_v51 = vadd.f32 %v866_v49, %v836_v26  ;;  %v796_v32 = vadd.f32 %v795_v48, %v1781_v4 }
 0x133   : > { %p1451_p10 = pnand %p1450_p9, %p1444_p5 }
 0x134   : > { %v797_v54 = vadd.f32 %v796_v32, %v1763_v41  ;;  %v868_v55 = vadd.f32 %v867_v51, %v837_v52  ;;  %v842_v41 = vmul.f32 %v1789_v12, %v1789_v12 }
 0x136   : > { %v869_v56 = vadd.f32 %v868_v55, %v838_v7  ;;  %v798_v58 = vadd.f32 %v797_v54, %v1770_v53 }
 0x138   : > { %v799_v60 = vadd.f32 %v798_v58, %v1792_v17  ;;  %v870_v61 = vadd.f32 %v869_v56, %v839_v18  ;;  %v771_v17 = vld [vmem:[%s1694_s15] sm:$0x1] }
 0x13a   : > { %v871_v62 = vadd.f32 %v870_v61, %v840_v59  ;;  %v800_v0 = vadd.f32 %v799_v60, %v1802_v25 }
 0x13c   : > { %v801_v2 = vadd.f32 %v800_v0, %v1789_v12  ;;  %v872_v53 = vadd.f32 %v871_v62, %v841_v1 }
 0x13e   : > { %v802_v4 = vadd.f32 %v801_v2, %v1798_v21  ;;  %v873_v5 = vadd.f32 %v872_v53, %v842_v41 }
 0x140   : > { %v803_v6 = vrot.slane %v802_v4, 4  ;;  %v874_v8 = vadd.f32 %v873_v5, %v843_v3 }
 0x142   : > { %v804_v9 = vadd.f32 %v803_v6, %v802_v4  ;;  %v875_v10 = vrot.slane %v874_v8, 4 }
 0x144   : > { %v805_v11 = vrot.slane %v804_v9, 2  ;;  %v876_v13 = vadd.f32 %v875_v10, %v874_v8 }
 0x146   : > { %v877_v14 = vrot.slane %v876_v13, 2  ;;  %v806_v12 = vadd.f32 %v805_v11, %v804_v9 }
 0x148   : > { %v807_v15 = vrot.slane %v806_v12, 1  ;;  %v878_v16 = vadd.f32 %v877_v14, %v876_v13 }
 0x14a   : > { %v808_v20 = vadd.f32 %v807_v15, %v806_v12  ;;  %v879_v21 = vrot.slane %v878_v16, 1 }
 0x14c   : > { %v809_v23 = vadd.f32 %v808_v20, %v771_v17  ;;  %v880_v24 = vadd.f32 %v879_v21, %v878_v16 }
 0x14e   : > { %810 = vst [vmem:[%s1694_s15] sm:$0x1] %v809_v23  ;;  %v881_v25 = vadd.f32 %v880_v24, %v811_v22 }
 0x14f   : > { %1454 = shalt.err (!%p1451_p10)
}
 0x150   : > { %s1455_s15 = scalar_lea.hbm %s1898_s10, 16  ;;  %s1459_s21 = scalar_lea.hbm %s1986_s4, 32 }
 0x151   : > { %p1456_p11 = scmp.ne.s32.totalorder %s1898_s10, %s1455_s15  ;;  %p1460_p0 = scmp.lt.u32.totalorder %s1898_s10, %s1986_s4 }
 0x152   : > { %p1461_p1 = scmp.lt.u32.totalorder %s1459_s21, %s1455_s15  ;;  %p1463_p3 = scmp.lt.u32.totalorder %s1455_s15, %s1898_s10 }
 0x153   : > { %p1457_p12 = pnand %p1456_p11, %p1631_p4 }
 0x154   : > { %p1462_p2 = por %p1461_p1, %p1460_p0 }
 0x155   : > { %p1458_p13 = pneg %p1457_p12 }
 0x156   : > { %p1464_p5 = por %p1463_p3, %p1462_p2 }
 0x158   : > { %p1465_p6 = pnand %p1464_p5, %p1458_p13 }
 0x15a   : > { %1468 = shalt.err (!%p1465_p6)
}
 0x15b   : > { %1330 = dma.vmem_to_hbm [thread:$0]  (%p1631_p4), %s1900_s9, 16, %s1898_s10, %s889_s27   ;;  %882 = vst [vmem:[%s1698_s16] sm:$0x1] %v881_v25 }
 0x15c   : > { %s1469_s29 = scalar_lea.vmem %s1908_s12, 16  ;;  %s1558_s8 = smov [#allocation6]  }
 0x15d   : > { %p1470_p7 = scmp.ne.s32.totalorder %s1908_s12, %s1469_s29  ;;  %s1473_s13 = sshll.u32 %s1558_s8, 4  ;;  %s1474_s13 = int_to_ptr.vmem [resolvable:$false] %s1473_s13 }
 0x15e   : > { %s1475_s15 = scalar_lea.vmem %s1474_s13, 32  ;;  %p1476_p11 = scmp.lt.s32.totalorder %s1908_s12, %s1474_s13 }
 0x15f   : > { %p1471_p9 = pnand %p1470_p7, %p1631_p4  ;;  %p1477_p12 = scmp.lt.s32.totalorder %s1475_s15, %s1469_s29 }
 0x161   : > { %p1472_p10 = pneg %p1471_p9  ;;  %p1478_p13 = por %p1477_p12, %p1476_p11 }
 0x163   : > { %p1479_p0 = pnand %p1478_p13, %p1472_p10 }
 0x165   : > { %1482 = shalt.err (!%p1479_p0)
}
 0x166   : > { %s1483_s16 = scalar_lea.hbm %s1906_s11, 16  ;;  %s1487_s14 = scalar_lea.hbm %s1987_s5, 32 }
 0x167   : > { %p1484_p1 = scmp.ne.s32.totalorder %s1906_s11, %s1483_s16  ;;  %p1488_p5 = scmp.lt.u32.totalorder %s1906_s11, %s1987_s5 }
 0x168   : > { %p1489_p6 = scmp.lt.u32.totalorder %s1487_s14, %s1483_s16  ;;  %p1491_p9 = scmp.lt.u32.totalorder %s1483_s16, %s1906_s11 }
 0x169   : > { %p1485_p2 = pnand %p1484_p1, %p1631_p4 }
 0x16a   : > { %p1490_p7 = por %p1489_p6, %p1488_p5 }
 0x16b   : > { %p1486_p3 = pneg %p1485_p2 }
 0x16c   : > { %p1492_p10 = por %p1491_p9, %p1490_p7 }
 0x16e   : > { %p1493_p11 = pnand %p1492_p10, %p1486_p3 }
 0x170   : > { %1496 = shalt.err (!%p1493_p11)
}
 0x171   : > { %1331 = dma.vmem_to_hbm [thread:$0]  (%p1631_p4), %s1908_s12, 16, %s1906_s11, %s889_s27  }
 0x172 PF: > { %p1345_p12 = scmp.ge.s32.totalorder %s1551_s23, 2  ;;  %s948_s24 = sand.u32 1, %s1531_s18  }
 0x173   : > { %s949_s17 = scalar_lea.sflag [#allocation3], %s948_s24 }
 0x174   : > { %p1336_p13 = pnand %p1345_p12, %p1640_p8 }
 0x176   : > { %1522 = dma.done.wait (!%p1336_p13), %s949_s17, 2048  }
 0x177   : > { %1524 = vsyncadd (!%p1336_p13), %s949_s17, 4294965248  ;;  %s1991_s29 = sadd.s32 4294967294, %s1551_s23  }
 0x178   : > { %s957_s8 = sand.u32 1, %s1991_s29  }
 0x179   : > { %s958_s28 = scalar_lea.sflag [#allocation5], %s957_s8 }
 0x17a   : > { %1526 = dma.done.wait (!%p1336_p13), %s958_s28, 32  }
 0x17b   : > { %1528 = vsyncadd (!%p1336_p13), %s958_s28, 4294967264  ;;  %s22_s23 = sadd.s32 1, %s1551_s23   ;;  %s1992_s18 = smov %s1535_s19 }
 0x17c   : > { %p19_p4 = scmp.ge.s32.totalorder %s22_s23, 4   ;;  %s1993_s19 = smov %s1539_s20 }
 0x17d   : > { %s1994_s20 = smov %s1646_s6  ;;  %s1995_s21 = smov %s1547_s22 }
 0x17e   : > { %s1996_s22 = smov %s1998_s26  ;;  %21 = sbr.rel (!%p19_p4) target bundleno = 6 (0x6), region = 103 }
 0x185   :  { %970 = vsyncpa [#allocation3], 1 }
 0x186   :  { %972 = vsyncpa [#allocation3 + $0x1], 1 }
 0x187   :  { %973 = vsyncpa [#allocation5], 1 }
 0x188   :  { %975 = vsyncpa [#allocation5 + $0x1], 1 }

</bundles_post_ra>
